<compile_context>
chip_gen: v5e
topology: v5e:2x2
jax: 0.10.0
libtpu: 0.0.40
codegen_flags: <defaults>
</compile_context>

<pallas_src>
import functools

import jax
import jax.numpy as jnp
from jax.experimental import pallas as pl
from jax.experimental.pallas import tpu as pltpu


_VMEM_LIMIT = 48 * 1024 * 1024   # explicit scoped-VMEM budget (v7x-safe)


# ----------------------------------------------------------------------------
# helpers
# ----------------------------------------------------------------------------
def _round_up(x, m):
    return ((x + m - 1) // m) * m


def _pad2(x, rows, cols):
    r, c = x.shape
    if r == rows and c == cols:
        return x
    return jnp.pad(x, ((0, rows - r), (0, cols - c)))


if hasattr(pl, "reciprocal"):
    def _approx_recip(x):
        return pl.reciprocal(x, approx=True)
else:  # very old jax fallback
    def _approx_recip(x):
        return 1.0 / x


# ----------------------------------------------------------------------------
# Pallas kernel 1: tiled matmul + bias (+ optional transposed output)
#   bf16 MXU inputs, f32 VMEM accumulator, pl.when init/finalize.
# ----------------------------------------------------------------------------
def _linear_kernel(a_ref, b_ref, *rest, activation, has_bias, out_transposed):
    if has_bias:
        bias_ref, o_ref, acc_ref = rest
    else:
        o_ref, acc_ref = rest

    @pl.when(pl.program_id(2) == 0)
    def _():
        acc_ref[...] = jnp.zeros_like(acc_ref)

    acc_ref[...] += jnp.dot(a_ref[...], b_ref[...],
                            preferred_element_type=jnp.float32)

    @pl.when(pl.program_id(2) == pl.num_programs(2) - 1)
    def _():
        out = acc_ref[...]
        if has_bias:
            out = out + bias_ref[...]
        if activation == "relu":
            out = jnp.maximum(out, 0.0)
        if out_transposed:
            out = out.T            # XLU transpose of the f32 tile at finalize
        o_ref[...] = out.astype(o_ref.dtype)


def pallas_linear(a, b, bias=None, activation="none", out_transposed=False,
                  out_dtype=jnp.float32, tm_cap=512, tn_cap=512, tk_cap=1024):
    """out = act(a @ b + bias); a:[M,K], b:[K,N] (b pre-transposed [in,out]).

    With out_transposed=True the result is emitted feature-major [N, M]
    (lane-dense along M), avoiding a separate HBM transpose afterwards.
    """
    M, K = a.shape
    K2, N = b.shape
    assert K == K2

    # bf16 packs 2 rows per sublane -> 16-row M grain (128 when the output is
    # transposed so both transpose operand/result dims sit on clean tiles).
    m_grain = 128 if out_transposed else 16
    Mp, Kp, Np = _round_up(M, m_grain), _round_up(K, 128), _round_up(N, 128)
    tm = Mp if Mp <= tm_cap else tm_cap
    Mp = _round_up(Mp, tm)
    tk = Kp if Kp <= tk_cap else tk_cap
    Kp = _round_up(Kp, tk)
    tn = Np if Np <= tn_cap else tn_cap
    Np = _round_up(Np, tn)

    a_p = _pad2(a.astype(jnp.bfloat16), Mp, Kp)
    b_p = _pad2(b.astype(jnp.bfloat16), Kp, Np)

    has_bias = bias is not None
    args = [a_p, b_p]
    in_specs = [
        pl.BlockSpec((tm, tk), lambda i, j, k: (i, k)),
        pl.BlockSpec((tk, tn), lambda i, j, k: (k, j)),
    ]
    if has_bias:
        args.append(_pad2(bias.reshape(1, N).astype(jnp.float32), 1, Np))
        in_specs.append(pl.BlockSpec((1, tn), lambda i, j, k: (0, j)))

    if out_transposed:
        out_shape = jax.ShapeDtypeStruct((Np, Mp), out_dtype)
        out_spec = pl.BlockSpec((tn, tm), lambda i, j, k: (j, i))
    else:
        out_shape = jax.ShapeDtypeStruct((Mp, Np), out_dtype)
        out_spec = pl.BlockSpec((tm, tn), lambda i, j, k: (i, j))

    out = pl.pallas_call(
        functools.partial(_linear_kernel, activation=activation,
                          has_bias=has_bias, out_transposed=out_transposed),
        out_shape=out_shape,
        grid=(Mp // tm, Np // tn, Kp // tk),
        in_specs=in_specs,
        out_specs=out_spec,
        scratch_shapes=[pltpu.VMEM((tm, tn), jnp.float32)],
        compiler_params=pltpu.CompilerParams(
            dimension_semantics=("parallel", "parallel", "arbitrary"),
            vmem_limit_bytes=_VMEM_LIMIT),
    )(*args)
    if out_transposed:
        return out[:N, :M]
    return out[:M, :N]


# ----------------------------------------------------------------------------
# Pallas kernel 2: fused GraphConv + REConv layer (feature-major, stacked)
#   out.T = mask_relu( dst_scale * ( A.T @ (x_scaled @ W_blk) ) + bias ).T
#   x_scaled is resident in VMEM (read from HBM once per layer).
# ----------------------------------------------------------------------------
def _gnn_kernel(a_ref, xt_ref, wt_ref, dsc_ref, bias_ref, o_ref, acc_ref,
                *, relu_rows, src_tile, num_src_tiles):
    k = pl.program_id(1)

    @pl.when(k == 0)
    def _():
        acc_ref[...] = jnp.zeros_like(acc_ref)

    if num_src_tiles == 1:
        xs = xt_ref[...]                                       # (Fp, tk) bf16
    else:
        start = pl.multiple_of(k * src_tile, src_tile)         # 128-aligned
        xs = xt_ref[:, pl.ds(start, src_tile)]

    # feature transform (never written back to HBM)
    yt = jnp.dot(wt_ref[...], xs, preferred_element_type=jnp.float32)
    # aggregation: contract over source nodes with A in its original layout
    acc_ref[...] += jnp.dot(yt.astype(jnp.bfloat16), a_ref[...],
                            preferred_element_type=jnp.float32)

    @pl.when(k == pl.num_programs(1) - 1)
    def _():
        out = acc_ref[...] * dsc_ref[...] + bias_ref[...]
        rows = jax.lax.broadcasted_iota(jnp.int32, out.shape, 0)
        # ReLU only on the GraphConv rows; REConv rows get GELU outside.
        out = jnp.where(rows < relu_rows, jnp.maximum(out, 0.0), out)
        o_ref[...] = out.astype(o_ref.dtype)


def fused_gnn_layer(A_p, x_stack_p, wt_blk, bias_col, dsc_p, *, tm, tk,
                    relu_rows, out_dtype):
    """A_p:[Ns,Nd] bf16, x_stack_p:[Fp,Ns] bf16 (already src-scaled),
    wt_blk:[Doutp,Fp] bf16, bias_col:[Doutp,1] f32, dsc_p:[1,Nd] f32."""
    Ns, Nd = A_p.shape
    Doutp, Fp = wt_blk.shape

    kern = functools.partial(_gnn_kernel, relu_rows=relu_rows, src_tile=tk,
                             num_src_tiles=Ns // tk)
    return pl.pallas_call(
        kern,
        out_shape=jax.ShapeDtypeStruct((Doutp, Nd), out_dtype),
        grid=(Nd // tm, Ns // tk),
        in_specs=[
            pl.BlockSpec((tk, tm), lambda i, k: (k, i)),       # A [src, dst]
            pl.BlockSpec((Fp, Ns), lambda i, k: (0, 0)),       # x (resident)
            pl.BlockSpec((Doutp, Fp), lambda i, k: (0, 0)),    # W.T (resident)
            pl.BlockSpec((1, tm), lambda i, k: (0, i)),        # dst scale
            pl.BlockSpec((Doutp, 1), lambda i, k: (0, 0)),     # bias column
        ],
        out_specs=pl.BlockSpec((Doutp, tm), lambda i, k: (0, i)),
        scratch_shapes=[pltpu.VMEM((Doutp, tm), jnp.float32)],
        compiler_params=pltpu.CompilerParams(
            dimension_semantics=("parallel", "arbitrary"),
            vmem_limit_bytes=_VMEM_LIMIT),
    )(A_p, x_stack_p, wt_blk, dsc_p, bias_col)


# ----------------------------------------------------------------------------
# Pallas kernel 3: fused AGTLayer over a block of sequences (lane-dense, Dp=128k)
# ----------------------------------------------------------------------------
def _agt_kernel(h_ref, rh_ref, wl_ref, wr_ref, attl_ref, attr_ref,
                wsrc_ref, wtgt_ref, wfin_ref, g_ref, b_ref, o_ref,
                *, seq_block, seq_len, nheads, head_dim, rl_dim, d_model,
                temper, beta_coef):
    f32 = jnp.float32
    bf16 = jnp.bfloat16
    BB, L = seq_block, seq_len
    M = BB * L
    Dp = h_ref.shape[1]

    h = h_ref[...]                                            # (M, Dp) f32
    h_bf = h.astype(bf16)
    rh_bf = rh_ref[...].astype(bf16)

    # projections for all heads & all sequences in the block: single matmuls
    fl = jnp.dot(h_bf, wl_ref[...], preferred_element_type=f32)       # (M, Dp)
    fr = jnp.dot(h_bf, wr_ref[...], preferred_element_type=f32)       # (M, Dp)
    rk = jnp.dot(rh_bf, wsrc_ref[...], preferred_element_type=f32)    # (M,nh*R)
    rq = jnp.dot(rh_bf, wtgt_ref[...], preferred_element_type=f32)    # (M,nh*R)

    # LeakyReLU(0.01) on projected features (as in the reference), then the
    # att_l/att_r scores via VPU multiply + per-head XLU lane reduction.
    lfl = jnp.where(fl > 0, fl, 0.01 * fl)
    lfr = jnp.where(fr > 0, fr, 0.01 * fr)
    al_prod = (lfl * attl_ref[...]).reshape(BB, L, Dp)
    ar_prod = (lfr * attr_ref[...]).reshape(BB, L, Dp)

    fr3 = fr.reshape(BB, L, Dp)
    rk3 = rk.reshape(BB, L, nheads * rl_dim)
    rq3 = rq.reshape(BB, L, nheads * rl_dim)

    ones = jnp.ones((BB, L, 1), f32)
    inv_t = 1.0 / temper
    fh = jnp.zeros((M, Dp), f32)
    for hd in range(nheads):                  # static, small head count
        c0 = hd * head_dim
        r0 = hd * rl_dim
        sl_h = jnp.sum(al_prod[:, :, c0:c0 + head_dim], axis=-1, keepdims=True)
        sr_h = jnp.sum(ar_prod[:, :, c0:c0 + head_dim], axis=-1, keepdims=True)
        rk_h = rk3[:, :, r0:r0 + rl_dim]      # (BB, L, R)
        rq_h = rq3[:, :, r0:r0 + rl_dim]
        # score[b,i,j] = sl[b,i] + sr[b,j] + beta * <rk[b,i,:], rq[b,j,:]>
        # folded into one batched contraction via lane augmentation (avoids
        # any in-kernel transpose/broadcast of the sr term).
        lhs = jnp.concatenate([beta_coef * rk_h, sl_h, ones], axis=-1)
        rhs = jnp.concatenate([rq_h, ones, sr_h], axis=-1)
        score = jax.lax.dot_general(
            lhs, rhs, (((2,), (2,)), ((0,), (0,))),
            preferred_element_type=f32) * inv_t               # (BB, L, L)
        score = score - jnp.max(score, axis=-1, keepdims=True)
        p = jnp.exp(score)
        p = p * _approx_recip(jnp.sum(p, axis=-1, keepdims=True))
        # dropout1 (p=0) -> identity
        ctx = jax.lax.dot_general(
            p, fr3[:, :, c0:c0 + head_dim], (((2,), (1,)), ((0,), (0,))),
            preferred_element_type=f32)                       # (BB, L, Dh)
        # accumulate the final projection head-by-head (no lane concat)
        fh = fh + jnp.dot(ctx.reshape(M, head_dim).astype(bf16),
                          wfin_ref[c0:c0 + head_dim, :],
                          preferred_element_type=f32)
    # dropout2 (p=0) -> identity

    # residual + LayerNorm over the REAL d_model lanes in f32.  Padded lanes
    # of h/fh are exactly zero, so E[x^2]-E[x]^2 with the real-D divisor
    # reproduces the unpadded LayerNorm; padded output lanes are re-zeroed by
    # the zero-padded gamma/beta.
    x = h + fh
    inv_d = 1.0 / d_model
    mean = jnp.sum(x, axis=-1, keepdims=True) * inv_d
    ex2 = jnp.sum(x * x, axis=-1, keepdims=True) * inv_d
    var = ex2 - mean * mean
    xn = (x - mean) * jax.lax.rsqrt(var + 1e-5)
    o_ref[...] = (xn * g_ref[...] + b_ref[...]).astype(o_ref.dtype)


def _prep_agt_params(agt_params, *, D, Dp, nheads):
    """Hoisted, one-time weight prep: D->Dp zero padding + bf16 casts."""
    prepped = []
    for p in agt_params:
        attl = jnp.zeros((1, Dp), jnp.float32).at[0, :D].set(
            jnp.tile(p["attl"].reshape(-1), nheads))
        attr = jnp.zeros((1, Dp), jnp.float32).at[0, :D].set(
            jnp.tile(p["attr"].reshape(-1), nheads))
        prepped.append({
            "wl": _pad2(p["wl"], Dp, Dp).astype(jnp.bfloat16),
            "wr": _pad2(p["wr"], Dp, Dp).astype(jnp.bfloat16),
            "wfin": _pad2(p["wfin"], Dp, Dp).astype(jnp.bfloat16),
            "attl": attl,
            "attr": attr,
            "wsrc": p["wsrc"].astype(jnp.bfloat16),
            "wtgt": p["wtgt"].astype(jnp.bfloat16),
            "ln_g": _pad2(p["ln_g"], 1, Dp).astype(jnp.float32),
            "ln_b": _pad2(p["ln_b"], 1, Dp).astype(jnp.float32),
        })
    return prepped


def agt_layer(h_pad, rh_pad, pp, *, BB, L, nheads, head_dim, rl_dim, d_model,
              temper, beta_coef):
    """h_pad: [rows_p, Dp] f32 (kept padded across layers), rh_pad: [rows_p, R]."""
    rows_p, Dp = h_pad.shape
    R = rh_pad.shape[1]
    blk = BB * L

    kern = functools.partial(
        _agt_kernel, seq_block=BB, seq_len=L, nheads=nheads,
        head_dim=head_dim, rl_dim=rl_dim, d_model=d_model,
        temper=temper, beta_coef=beta_coef)

    return pl.pallas_call(
        kern,
        out_shape=jax.ShapeDtypeStruct((rows_p, Dp), jnp.float32),
        grid=(rows_p // blk,),
        in_specs=[
            pl.BlockSpec((blk, Dp), lambda i: (i, 0)),         # h (flat rows)
            pl.BlockSpec((blk, R), lambda i: (i, 0)),          # rh
            pl.BlockSpec((Dp, Dp), lambda i: (0, 0)),          # W_l  [in,out]
            pl.BlockSpec((Dp, Dp), lambda i: (0, 0)),          # W_r
            pl.BlockSpec((1, Dp), lambda i: (0, 0)),           # att_l (tiled)
            pl.BlockSpec((1, Dp), lambda i: (0, 0)),           # att_r (tiled)
            pl.BlockSpec((R, nheads * R), lambda i: (0, 0)),   # r_source
            pl.BlockSpec((R, nheads * R), lambda i: (0, 0)),   # r_target
            pl.BlockSpec((Dp, Dp), lambda i: (0, 0)),          # W_final
            pl.BlockSpec((1, Dp), lambda i: (0, 0)),           # LN gamma
            pl.BlockSpec((1, Dp), lambda i: (0, 0)),           # LN beta
        ],
        out_specs=pl.BlockSpec((blk, Dp), lambda i: (i, 0)),
        compiler_params=pltpu.CompilerParams(
            dimension_semantics=("parallel",),
            vmem_limit_bytes=_VMEM_LIMIT),
    )(h_pad, rh_pad, pp["wl"], pp["wr"], pp["attl"], pp["attr"],
      pp["wsrc"], pp["wtgt"], pp["wfin"], pp["ln_g"], pp["ln_b"])


# ----------------------------------------------------------------------------
# HINormer forward (glue in JAX, hot loops in the Pallas kernels above)
# ----------------------------------------------------------------------------
def hinormer_forward(params, features_list, seqs, type_emb, node_type, A,
                     *, num_gnns, num_layers, nheads, temper, beta, norm=True):
    N = A.shape[0]
    D = params["fc_w"][0].shape[1]
    R = type_emb.shape[1]

    # ---- per-type input projections, emitted feature-major [D, n_t] (bf16
    #      when a GNN layer follows; the next kernel consumes bf16 anyway) ----
    proj_dtype = jnp.bfloat16 if num_gnns > 0 else jnp.float32
    ght = jnp.concatenate(
        [pallas_linear(feat, params["fc_w"][t], bias=params["fc_b"][t],
                       out_transposed=True, out_dtype=proj_dtype)
         for t, feat in enumerate(features_list)], axis=1)     # [D, N]
    rt = type_emb.T[:, node_type]                              # [R, N] f32

    # ---- degree normalization (both-sided, degrees clamped to >= 1) ----
    out_deg = jnp.clip(jnp.sum(A, axis=1), 1.0)
    in_deg = jnp.clip(jnp.sum(A, axis=0), 1.0)
    norm_out = out_deg ** -0.5                                 # source-side
    norm_in = in_deg ** -0.5                                   # destination

    # ---- GNN tiling (shared across layers); A stays [src, dst], bf16 ----
    dst_cap, src_cap = 512, 1024
    if N > dst_cap:
        tm = dst_cap
        Nd = _round_up(N, tm)
    else:
        Nd = _round_up(N, 8)
        tm = Nd
        if Nd >= 256 and Nd % 256 == 0:
            tm = Nd // 2          # >= 2 parallel dst tiles (v7x megacore)
    if N > src_cap:
        tk = src_cap
        Ns = _round_up(N, tk)
    else:
        Ns = _round_up(N, 8)
        tk = Ns
    A_p = _pad2(A.astype(jnp.bfloat16), Ns, Nd)
    dsc_p = _pad2(norm_in.reshape(1, N).astype(jnp.float32), 1, Nd)

    F_in = D + R
    Fp = _round_up(F_in, 8)
    Doutp = Fp

    for layer in range(num_gnns):
        wt_vec = params["re_wt"][layer][node_type]             # [N]
        # stacked feature-major input, src scales pre-folded (thin tensor)
        x_stack = jnp.concatenate(
            [ght.astype(jnp.float32) * norm_out[None, :],
             rt.astype(jnp.float32) * (norm_out * wt_vec)[None, :]], axis=0)
        x_stack_p = _pad2(x_stack, Fp, Ns).astype(jnp.bfloat16)
        # block-diagonal weight so one A pass serves both GCN and REConv
        W_blk = jnp.zeros((F_in, F_in), jnp.float32)
        W_blk = W_blk.at[:D, :D].set(params["gcn_w"][layer])
        W_blk = W_blk.at[D:, D:].set(params["re_w"][layer])
        wt_blk = _pad2(W_blk.T, Doutp, Fp).astype(jnp.bfloat16)
        bias_col = _pad2(
            jnp.concatenate([params["gcn_b"][layer],
                             params["re_b"][layer]]).reshape(-1, 1)
            .astype(jnp.float32), Doutp, 1)
        out_dtype = jnp.float32 if layer == num_gnns - 1 else jnp.bfloat16

        out = fused_gnn_layer(A_p, x_stack_p, wt_blk, bias_col, dsc_p,
                              tm=tm, tk=tk, relu_rows=D, out_dtype=out_dtype)
        ght = out[:D, :N]                      # GraphConv stream (ReLU'd)
        # Drop(p=0) -> identity
        # TODO(synk): exact-erf GELU kept in JAX glue (tiny [num_type, N]).
        rt = jax.nn.gelu(out[D:D + R, :N].astype(jnp.float32),
                         approximate=False)

    ght = ght.astype(jnp.float32)
    rt = rt.astype(jnp.float32)

    # ---- gather sequence tokens (single gather, reused by all AGT layers) ----
    # TODO(synk): gather gh[seqs]/r[seqs] via scalar-prefetch inside the AGT
    # kernel; kept as a single JAX gather on the feature-major columns.
    idx = seqs.reshape(-1)
    h2 = ght[:, idx].T                                         # [B*L, D]
    rh2 = rt[:, idx].T                                         # [B*L, R]

    # ---- AGT stage: pad D -> Dp (multiple of 128) once, pad rows once ----
    B, L = seqs.shape
    Dp = _round_up(D, 128)
    Dh = D // nheads

    max_block_rows = 256          # v7x-safe (many live f32 (BB*L, Dp) temps)
    bb_cap = max(1, max_block_rows // L)
    if B >= 2:
        bb_cap = min(bb_cap, (B + 1) // 2)   # >= 2 parallel steps (megacore)
    BB = max(1, min(B, bb_cap))
    while BB < B and (BB * L) % 8 != 0:
        BB += 1
    if (BB * L) % 8 != 0:
        BB = B
    Bp = _round_up(B, BB)
    rows_p = Bp * L

    h_pad = _pad2(h2, rows_p, Dp)
    rh_pad = _pad2(rh2, rows_p, R)

    # weight prep (padding + bf16 casts) hoisted out of the layer loop
    agt_prepped = _prep_agt_params(params["agt"], D=D, Dp=Dp, nheads=nheads)

    for layer in range(num_layers):
        h_pad = agt_layer(h_pad, rh_pad, agt_prepped[layer], BB=BB, L=L,
                          nheads=nheads, head_dim=Dh, rl_dim=R, d_model=D,
                          temper=temper, beta_coef=beta)

    output = h_pad.reshape(Bp, L, Dp)[:B, 0, :D]
    if norm:
        output = output / (jnp.linalg.norm(output, axis=1, keepdims=True)
                           + 1e-12)
    return output


# ----------------------------------------------------------------------------
# Deterministic parameter / input construction and driver
# ----------------------------------------------------------------------------
def _make_params(key, input_dims, D, num_gnns, num_layers, nheads, num_type):
    Dh = D // nheads
    keys = iter(jax.random.split(key, 64))

    def rnd(shape, scale=0.1):
        return (scale * jax.random.normal(next(keys), shape)).astype(jnp.float32)

    params = {
        # nn.Linear weights stored pre-transposed as [in, out]
        "fc_w": [rnd((d, D)) for d in input_dims],
        "fc_b": [rnd((D,)) for _ in input_dims],
        "gcn_w": [rnd((D, D)) for _ in range(num_gnns)],
        "gcn_b": [jnp.zeros((D,), jnp.float32) for _ in range(num_gnns)],
        "re_w": [rnd((num_type, num_type)) for _ in range(num_gnns)],
        "re_b": [jnp.zeros((num_type,), jnp.float32) for _ in range(num_gnns)],
        "re_wt": [jnp.ones((num_type,), jnp.float32) for _ in range(num_gnns)],
        "agt": [],
    }
    for _ in range(num_layers):
        params["agt"].append({
            "wl": rnd((D, D)),
            "wr": rnd((D, D)),
            "attl": rnd((1, Dh)),
            "attr": rnd((1, Dh)),
            "wsrc": rnd((num_type, num_type * nheads)),
            "wtgt": rnd((num_type, num_type * nheads)),
            "wfin": rnd((D, D)),
            "ln_g": jnp.ones((1, D), jnp.float32),
            "ln_b": jnp.zeros((1, D), jnp.float32),
        })
    return params


if __name__ == "__main__":
    # small config consistent with HINormer's forward
    D = 32                # embeddings_dimension
    NHEADS = 2
    NUM_GNNS = 2
    NUM_LAYERS = 2
    NUM_TYPE = 4          # rl_dim == num_type
    TEMPER = 1.0
    BETA = 1.0
    input_dims = [12, 10]         # two node types with different raw feature dims
    nodes_per_type = [6, 6]
    N = sum(nodes_per_type)       # 12 graph nodes
    B, L = 4, 8                   # seqs: 4 sequences of length 8

    key = jax.random.PRNGKey(0)
    k_feat, k_graph, k_seq, k_emb, k_par = jax.random.split(key, 5)

    fkeys = jax.random.split(k_feat, len(input_dims))
    features_list = [
        jax.random.normal(fkeys[t], (nodes_per_type[t], input_dims[t]),
                          dtype=jnp.float32)
        for t in range(len(input_dims))
    ]
    node_type = jnp.concatenate(
        [jnp.full((nodes_per_type[t],), t, jnp.int32)
         for t in range(len(input_dims))]
    )                                                            # [N]
    type_emb = jax.random.normal(k_emb, (NUM_TYPE, NUM_TYPE), dtype=jnp.float32)

    # deterministic adjacency (with self loops so no node is isolated)
    A = jax.random.bernoulli(k_graph, 0.4, (N, N)).astype(jnp.float32)
    A = jnp.maximum(A, jnp.eye(N, dtype=jnp.float32))

    seqs = jax.random.randint(k_seq, (B, L), 0, N)               # node-index sequences

    params = _make_params(k_par, input_dims, D, NUM_GNNS, NUM_LAYERS,
                          NHEADS, NUM_TYPE)

    out = hinormer_forward(
        params, features_list, seqs, type_emb, node_type, A,
        num_gnns=NUM_GNNS, num_layers=NUM_LAYERS, nheads=NHEADS,
        temper=TEMPER, beta=BETA, norm=True,
    )
    out = jax.block_until_ready(out)

    assert out.shape == (B, D), out.shape
    assert bool(jnp.all(jnp.isfinite(out)))
    print("KERNEL_OK")
</pallas_src>

<mosaic_0001>
module attributes {stable_mosaic.version = 11 : i64} {
  func.func @_linear_kernel(%arg0: i32, %arg1: i32, %arg2: i32, %arg3: memref<128x128xbf16, #tpu.memory_space<vmem>>, %arg4: memref<128x128xbf16, #tpu.memory_space<vmem>>, %arg5: memref<1x128xf32, #tpu.memory_space<vmem>>, %arg6: memref<128x128xbf16, #tpu.memory_space<vmem>>, %arg7: memref<128x128xf32, #tpu.memory_space<vmem>>) attributes {dimension_semantics = [#tpu.dimension_semantics<parallel>, #tpu.dimension_semantics<parallel>, #tpu.dimension_semantics<arbitrary>], iteration_bounds = array<i64: 1, 1, 1>, scalar_prefetch = 0 : i64, scratch_operands = 1 : i64, tpu.core_type = #tpu.core_type<tc>, window_params = [{transform_indices = @transform_0, window_bounds = array<i64: 128, 128>}, {transform_indices = @transform_1, window_bounds = array<i64: 128, 128>}, {transform_indices = @transform_2, window_bounds = array<i64: 1, 128>}, {transform_indices = @transform_3, window_bounds = array<i64: 128, 128>}]} {
    %c0_i32 = arith.constant 0 : i32
    %0 = arith.cmpi eq, %arg2, %c0_i32 : i32
    %1 = arith.extui %0 : i1 to i32
    %c0_i32_0 = arith.constant 0 : i32
    %2 = arith.cmpi ne, %1, %c0_i32_0 : i32
    scf.if %2 {
      %cst_10 = arith.constant 0.000000e+00 : f32
      %12 = vector.broadcast %cst_10 : f32 to vector<128x128xf32>
      %c0_11 = arith.constant 0 : index
      %c0_12 = arith.constant 0 : index
      %13 = vector.load %arg7[%c0_11, %c0_12] : memref<128x128xf32, #tpu.memory_space<vmem>>, vector<128x128xf32>
      tpu.vector_store %arg7[%c0_11, %c0_12], %12 {strides = array<i32>} : memref<128x128xf32, #tpu.memory_space<vmem>>, vector<128x128xf32>,
    } else {
    }
    %c0 = arith.constant 0 : index
    %c0_1 = arith.constant 0 : index
    %3 = vector.load %arg7[%c0, %c0_1] : memref<128x128xf32, #tpu.memory_space<vmem>>, vector<128x128xf32>
    %c0_2 = arith.constant 0 : index
    %c0_3 = arith.constant 0 : index
    %4 = vector.load %arg3[%c0_2, %c0_3] : memref<128x128xbf16, #tpu.memory_space<vmem>>, vector<128x128xbf16>
    %c0_4 = arith.constant 0 : index
    %c0_5 = arith.constant 0 : index
    %5 = vector.load %arg4[%c0_4, %c0_5] : memref<128x128xbf16, #tpu.memory_space<vmem>>, vector<128x128xbf16>
    %cst = arith.constant dense<0.000000e+00> : vector<128x128xf32>
    %6 = tpu.matmul %4, %5, %cst {dimension_numbers = #tpu.dot_dimension_numbers<[1], [0], [0], [1], [0, 0, 1, 1], [], []>} : vector<128x128xbf16>, vector<128x128xbf16>, vector<128x128xf32> -> vector<128x128xf32>
    %7 = arith.addf %3, %6 : vector<128x128xf32>
    %c0_6 = arith.constant 0 : index
    %c0_7 = arith.constant 0 : index
    %8 = vector.load %arg7[%c0_6, %c0_7] : memref<128x128xf32, #tpu.memory_space<vmem>>, vector<128x128xf32>
    tpu.vector_store %arg7[%c0_6, %c0_7], %7 {strides = array<i32>} : memref<128x128xf32, #tpu.memory_space<vmem>>, vector<128x128xf32>,
    %c0_i32_8 = arith.constant 0 : i32
    %9 = arith.cmpi eq, %arg2, %c0_i32_8 : i32
    %10 = arith.extui %9 : i1 to i32
    %c0_i32_9 = arith.constant 0 : i32
    %11 = arith.cmpi ne, %10, %c0_i32_9 : i32
    scf.if %11 {
      %c0_10 = arith.constant 0 : index
      %c0_11 = arith.constant 0 : index
      %12 = vector.load %arg7[%c0_10, %c0_11] : memref<128x128xf32, #tpu.memory_space<vmem>>, vector<128x128xf32>
      %c0_12 = arith.constant 0 : index
      %c0_13 = arith.constant 0 : index
      %13 = vector.load %arg5[%c0_12, %c0_13] : memref<1x128xf32, #tpu.memory_space<vmem>>, vector<1x128xf32>
      %14 = vector.broadcast %13 : vector<1x128xf32> to vector<128x128xf32>
      %15 = arith.addf %12, %14 : vector<128x128xf32>
      %16 = tpu.transpose %15, [1, 0] : vector<128x128xf32> -> vector<128x128xf32>
      %17 = arith.truncf %16 : vector<128x128xf32> to vector<128x128xbf16>
      %c0_14 = arith.constant 0 : index
      %c0_15 = arith.constant 0 : index
      %18 = vector.load %arg6[%c0_14, %c0_15] : memref<128x128xbf16, #tpu.memory_space<vmem>>, vector<128x128xbf16>
      tpu.vector_store %arg6[%c0_14, %c0_15], %17 {strides = array<i32>} : memref<128x128xbf16, #tpu.memory_space<vmem>>, vector<128x128xbf16>,
    } else {
    }
    return
  }
  func.func @transform_0(%arg0: i32, %arg1: i32, %arg2: i32) -> (i32, i32) {
    %c0_i32 = arith.constant 0 : i32
    return %arg0, %arg2 : i32, i32
  }
  func.func @transform_1(%arg0: i32, %arg1: i32, %arg2: i32) -> (i32, i32) {
    %c0_i32 = arith.constant 0 : i32
    return %arg2, %arg1 : i32, i32
  }
  func.func @transform_2(%arg0: i32, %arg1: i32, %arg2: i32) -> (i32, i32) {
    %c0_i32 = arith.constant 0 : i32
    %c0_i32_0 = arith.constant 0 : i32
    return %c0_i32, %arg1 : i32, i32
  }
  func.func @transform_3(%arg0: i32, %arg1: i32, %arg2: i32) -> (i32, i32) {
    %c0_i32 = arith.constant 0 : i32
    return %arg1, %arg0 : i32, i32
  }
}

</mosaic_0001>

<bundles_post_ra>
// kernel: tpu_custom_call.1
= control target key start
LH: loop header
LB: loop body
LE: loop exit
PB: predicated region body
PF: predicated region fallthrough
CT: control target
= control target key end

     0   :  { %8 = vsyncpa [#allocation4], 0  ;;  %s696_s0 = inlined_call_operand.hbm [shape: bf16[128,128], index: 0, kind: input, shape index: {}]   ;;  %s697_s1 = inlined_call_operand.hbm [shape: bf16[128,128], index: 1, kind: input, shape index: {}]   ;;  %s698_s2 = inlined_call_operand.vmem [shape: f32[1,128], index: 2, kind: input, shape index: {}]   ;;  %s699_s3 = inlined_call_operand.hbm [shape: bf16[128,128], index: 3, kind: output, shape index: {}]  }
   0x1   :  { %9 = vsyncpa [#allocation7], 0 }
   0x2   :  { %10 = vsyncpa [#allocation5], 0  ;;  %s15_s14 = sshll.u32 %s696_s0, 4  ;;  %s650_s15 = smov [#allocation3]   ;;  %s16_s14 = int_to_ptr.hbm [resolvable:$true] %s15_s14 }
   0x3   :  { %s17_s16 = sshll.u32 %s650_s15, 4  ;;  %s28_s19 = sshll.u32 %s697_s1, 4  ;;  %s18_s16 = int_to_ptr.vmem [resolvable:$true] %s17_s16  ;;  %s29_s19 = int_to_ptr.hbm [resolvable:$true] %s28_s19 }
   0x4   :  { %s651_s20 = smov 64   ;;  %s652_s21 = smov 4  }
   0x5   :  { %23 = dma.hbm_to_vmem [thread:$0]  %s16_s14, 1024, %s18_s16, [#allocation4], %s651_s20, %s651_s20, %s652_s21  }
   0x6   :  { %s653_s22 = smov [#allocation6]  }
   0x7   :  { %s30_s23 = sshll.u32 %s653_s22, 4  ;;  %s31_s23 = int_to_ptr.vmem [resolvable:$true] %s30_s23 }
   0x8   :  { %36 = dma.hbm_to_vmem [thread:$0]  %s29_s19, 1024, %s31_s23, [#allocation7], %s651_s20, %s651_s20, %s652_s21  }
   0x9   :  { %644 = dma.done.wait [#allocation4], 1024  }
   0xa   :  { %645 = vsyncadd [#allocation4], 4294966272 }
   0xb   :  { %646 = dma.done.wait [#allocation7], 1024  }
   0xc   :  { %647 = vsyncadd [#allocation7], 4294966272  ;;  %v494_v0 = vld [vmem:[#allocation6 + $0x38] sm:$0xff]  ;;  %v493_v1 = vld [vmem:[#allocation6 + $0x30] sm:$0xff]  ;;  %s401_s27 = sshll.u32 %s699_s3, 4  ;;  %s402_s27 = int_to_ptr.hbm [resolvable:$true] %s401_s27 }
   0xd   :  { %211 = vmatpush.bf16.msra.mxu0 %v494_v0  ;;  %542 = vmatpush.bf16.msra.mxu1 %v494_v0  ;;  %v492_v2 = vld [vmem:[#allocation6 + $0x28] sm:$0xff]  ;;  %v491_v3 = vld [vmem:[#allocation6 + $0x20] sm:$0xff]  ;;  %v490_v4 = vld [vmem:[#allocation6 + $0x18] sm:$0xff] }
   0xe   :  { %543 = vmatpush.bf16.msra.mxu2 %v494_v0  ;;  %544 = vmatpush.bf16.msra.mxu3 %v494_v0  ;;  %v489_v5 = vld [vmem:[#allocation6 + $0x10] sm:$0xff]  ;;  %v488_v6 = vld [vmem:[#allocation6 + $0x8] sm:$0xff]  ;;  %v487_v7 = vld [vmem:[#allocation6] sm:$0xff] }
   0xf   :  { %v479_v8 = vld [vmem:[#allocation3] sm:$0xff]  ;;  %v481_v9 = vld [vmem:[#allocation3 + $0x10] sm:$0xff]  ;;  %v480_v12 = vld [vmem:[#allocation3 + $0x8] sm:$0xff] }
  0x10   :  { %v483_v10 = vld [vmem:[#allocation3 + $0x20] sm:$0xff]  ;;  %v485_v11 = vld [vmem:[#allocation3 + $0x30] sm:$0xff]  ;;  %v482_v13 = vld [vmem:[#allocation3 + $0x18] sm:$0xff] }
  0x11   :  { %212 = vmatpush.bf16.msra.mxu0 %v493_v1  ;;  %545 = vmatpush.bf16.msra.mxu1 %v493_v1  ;;  %v484_v14 = vld [vmem:[#allocation3 + $0x28] sm:$0xff]  ;;  %v486_v15 = vld [vmem:[#allocation3 + $0x38] sm:$0xff]  ;;  %v571_v16 = vld [vmem:[%s698_s2] ss:$0 sm:$0xff]  ;;  %s654_s2 = smov [#allocation8]  }
  0x12   :  { %546 = vmatpush.bf16.msra.mxu2 %v493_v1  ;;  %547 = vmatpush.bf16.msra.mxu3 %v493_v1  ;;  %s399_s24 = sshll.u32 %s654_s2, 4  ;;  %s400_s24 = int_to_ptr.vmem [resolvable:$true] %s399_s24 }
  0x15   :  { %213 = vmatpush.bf16.msra.mxu0 %v492_v2  ;;  %548 = vmatpush.bf16.msra.mxu1 %v492_v2 }
  0x16   :  { %549 = vmatpush.bf16.msra.mxu2 %v492_v2  ;;  %550 = vmatpush.bf16.msra.mxu3 %v492_v2 }
  0x19   :  { %214 = vmatpush.bf16.msra.mxu0 %v491_v3  ;;  %551 = vmatpush.bf16.msra.mxu1 %v491_v3 }
  0x1a   :  { %552 = vmatpush.bf16.msra.mxu2 %v491_v3  ;;  %553 = vmatpush.bf16.msra.mxu3 %v491_v3 }
  0x1d   :  { %215 = vmatpush.bf16.msra.mxu0 %v490_v4  ;;  %554 = vmatpush.bf16.msra.mxu1 %v490_v4 }
  0x1e   :  { %555 = vmatpush.bf16.msra.mxu2 %v490_v4  ;;  %556 = vmatpush.bf16.msra.mxu3 %v490_v4 }
  0x21   :  { %216 = vmatpush.bf16.msra.mxu0 %v489_v5  ;;  %557 = vmatpush.bf16.msra.mxu1 %v489_v5 }
  0x22   :  { %558 = vmatpush.bf16.msra.mxu2 %v489_v5  ;;  %559 = vmatpush.bf16.msra.mxu3 %v489_v5 }
  0x25   :  { %217 = vmatpush.bf16.msra.mxu0 %v488_v6  ;;  %560 = vmatpush.bf16.msra.mxu1 %v488_v6 }
  0x26   :  { %561 = vmatpush.bf16.msra.mxu2 %v488_v6  ;;  %562 = vmatpush.bf16.msra.mxu3 %v488_v6 }
  0x29   :  { %218 = vmatpush.bf16.msra.mxu0 %v487_v7  ;;  %563 = vmatpush.bf16.msra.mxu1 %v487_v7 }
  0x2a   :  { %564 = vmatpush.bf16.msra.mxu2 %v487_v7  ;;  %565 = vmatpush.bf16.msra.mxu3 %v487_v7 }
  0x2c   :  { %219 = vmatmul.bf16.vlgmr.msra.gmra.mxu0 %v479_v8  ;;  %229 = vmatmul.bf16.vlgmr.msra.gmra.mxu1 %v481_v9 }
  0x2d   :  { %239 = vmatmul.bf16.vlgmr.msra.gmra.mxu2 %v483_v10  ;;  %249 = vmatmul.bf16.vlgmr.msra.gmra.mxu3 %v485_v11 }
  0x3c   :  { %224 = vmatmul.bf16.gmra.mxu0 %v480_v12  ;;  %234 = vmatmul.bf16.gmra.mxu1 %v482_v13 }
  0x3d   :  { %244 = vmatmul.bf16.gmra.mxu2 %v484_v14  ;;  %254 = vmatmul.bf16.gmra.mxu3 %v486_v15 }
  0xa9   :  { %v220_v17 = vpop.f32.mrf.mxu0  ;;  %v230_v24 = vpop.f32.mrf.mxu1 }
  0xaa   :  { %v315_v18 = vadd.f32 %v571_v16, %v220_v17  ;;  %v319_v26 = vadd.f32 %v571_v16, %v230_v24 }
  0xac   :  { %331 = vxpose.xlu0.b32.start [1/16] %v315_v18, 128 }
  0xb0   :  { %v240_v32 = vpop.f32.mrf.mxu2  ;;  %v250_v40 = vpop.f32.mrf.mxu3 }
  0xb1   :  { %v222_v19 = vpop.f32.mrf.mxu0  ;;  %v232_v27 = vpop.f32.mrf.mxu1  ;;  %v323_v34 = vadd.f32 %v571_v16, %v240_v32  ;;  %v327_v42 = vadd.f32 %v571_v16, %v250_v40 }
  0xb2   :  { %v316_v20 = vadd.f32 %v571_v16, %v222_v19  ;;  %v320_v28 = vadd.f32 %v571_v16, %v232_v27 }
  0xb4   :  { %332 = vxpose.xlu0.b32.cont [2/16] %v316_v20, 128 }
  0xb8   :  { %v242_v35 = vpop.f32.mrf.mxu2  ;;  %v252_v43 = vpop.f32.mrf.mxu3 }
  0xb9   :  { %v225_v21 = vpop.f32.mrf.mxu0  ;;  %v235_v29 = vpop.f32.mrf.mxu1  ;;  %v324_v36 = vadd.f32 %v571_v16, %v242_v35  ;;  %v328_v44 = vadd.f32 %v571_v16, %v252_v43 }
  0xba   :  { %v317_v22 = vadd.f32 %v571_v16, %v225_v21  ;;  %v321_v30 = vadd.f32 %v571_v16, %v235_v29 }
  0xbc   :  { %333 = vxpose.xlu0.b32.cont [3/16] %v317_v22, 128 }
  0xc0   :  { %v245_v37 = vpop.f32.mrf.mxu2  ;;  %v255_v45 = vpop.f32.mrf.mxu3 }
  0xc1   :  { %v227_v23 = vpop.f32.mrf.mxu0  ;;  %v237_v31 = vpop.f32.mrf.mxu1  ;;  %v325_v38 = vadd.f32 %v571_v16, %v245_v37  ;;  %v329_v46 = vadd.f32 %v571_v16, %v255_v45 }
  0xc2   :  { %v318_v25 = vadd.f32 %v571_v16, %v227_v23  ;;  %v322_v33 = vadd.f32 %v571_v16, %v237_v31 }
  0xc4   :  { %334 = vxpose.xlu0.b32.cont [4/16] %v318_v25, 128 }
  0xc8   :  { %v247_v39 = vpop.f32.mrf.mxu2  ;;  %v257_v47 = vpop.f32.mrf.mxu3 }
  0xc9   :  { %v326_v41 = vadd.f32 %v571_v16, %v247_v39  ;;  %v330_v48 = vadd.f32 %v571_v16, %v257_v47 }
  0xcc   :  { %335 = vxpose.xlu0.b32.cont [5/16] %v319_v26, 128 }
  0xd4   :  { %336 = vxpose.xlu0.b32.cont [6/16] %v320_v28, 128 }
  0xdc   :  { %337 = vxpose.xlu0.b32.cont [7/16] %v321_v30, 128 }
  0xe4   :  { %338 = vxpose.xlu0.b32.cont [8/16] %v322_v33, 128 }
  0xec   :  { %339 = vxpose.xlu0.b32.cont [9/16] %v323_v34, 128 }
  0xf4   :  { %340 = vxpose.xlu0.b32.cont [10/16] %v324_v36, 128 }
  0xfc   :  { %341 = vxpose.xlu0.b32.cont [11/16] %v325_v38, 128 }
 0x104   :  { %342 = vxpose.xlu0.b32.cont [12/16] %v326_v41, 128 }
 0x10c   :  { %343 = vxpose.xlu0.b32.cont [13/16] %v327_v42, 128 }
 0x114   :  { %344 = vxpose.xlu0.b32.cont [14/16] %v328_v44, 128 }
 0x11c   :  { %345 = vxpose.xlu0.b32.cont [15/16] %v329_v46, 128 }
 0x124   :  { %346 = vxpose.xlu0.b32.end [16/16] %v330_v48, 128 }
 0x150   :  { %v347_v49 = vpop.trf.xlu0 }
 0x158   :  { %v348_v50 = vpop.trf.xlu0 }
 0x159   :  { %v498_v51 = vpack.c.bf16 %v348_v50, %v347_v49 }
 0x15b   :  { %499 = vst [vmem:[#allocation8] sm:$0xff] %v498_v51  }
 0x160   :  { %v349_v52 = vpop.trf.xlu0 }
 0x168   :  { %v350_v53 = vpop.trf.xlu0 }
 0x169   :  { %v503_v54 = vpack.c.bf16 %v350_v53, %v349_v52 }
 0x16b   :  { %535 = vst [vmem:[#allocation8 + $0x8] sm:$0xff] %v503_v54  }
 0x170   :  { %v351_v55 = vpop.trf.xlu0 }
 0x178   :  { %v352_v56 = vpop.trf.xlu0 }
 0x179   :  { %v508_v57 = vpack.c.bf16 %v352_v56, %v351_v55 }
 0x17b   :  { %536 = vst [vmem:[#allocation8 + $0x10] sm:$0xff] %v508_v57  }
 0x180   :  { %v353_v58 = vpop.trf.xlu0 }
 0x188   :  { %v354_v59 = vpop.trf.xlu0 }
 0x189   :  { %v513_v60 = vpack.c.bf16 %v354_v59, %v353_v58 }
 0x18b   :  { %537 = vst [vmem:[#allocation8 + $0x18] sm:$0xff] %v513_v60  }
 0x190   :  { %v355_v61 = vpop.trf.xlu0 }
 0x198   :  { %v356_v62 = vpop.trf.xlu0 }
 0x199   :  { %v518_v63 = vpack.c.bf16 %v356_v62, %v355_v61 }
 0x19b   :  { %538 = vst [vmem:[#allocation8 + $0x20] sm:$0xff] %v518_v63  }
 0x1a0   :  { %v357_v0 = vpop.trf.xlu0 }
 0x1a8   :  { %v358_v1 = vpop.trf.xlu0 }
 0x1a9   :  { %v523_v2 = vpack.c.bf16 %v358_v1, %v357_v0 }
 0x1ab   :  { %539 = vst [vmem:[#allocation8 + $0x28] sm:$0xff] %v523_v2  }
 0x1b0   :  { %v359_v3 = vpop.trf.xlu0 }
 0x1b8   :  { %v360_v4 = vpop.trf.xlu0 }
 0x1b9   :  { %v528_v5 = vpack.c.bf16 %v360_v4, %v359_v3 }
 0x1bb   :  { %540 = vst [vmem:[#allocation8 + $0x30] sm:$0xff] %v528_v5  }
 0x1c0   :  { %v361_v6 = vpop.trf.xlu0 }
 0x1c8   :  { %v362_v7 = vpop.trf.xlu0 }
 0x1c9   :  { %v533_v8 = vpack.c.bf16 %v362_v7, %v361_v6 }
 0x1cb   :  { %541 = vst [vmem:[#allocation8 + $0x38] sm:$0xff] %v533_v8  }
 0x1cc   :  { %407 = dma.vmem_to_hbm [thread:$0]  %s400_s24, 1024, %s402_s27, [#allocation5], %s651_s20, %s651_s20, %s652_s21  }
 0x1cd   :  { %648 = dma.done.wait [#allocation5], 1024  }
 0x1ce   :  { %649 = vsyncadd [#allocation5], 4294966272 }
 0x1cf   :  { %412 = vsyncpa [#allocation4], 1 }
 0x1d0   :  { %413 = vsyncpa [#allocation7], 1 }
 0x1d1   :  { %414 = vsyncpa [#allocation5], 1 }

</bundles_post_ra>
